<compile_context>
chip_gen: v7x
topology: tpu7x:2x2x1
jax: 0.10.0
libtpu: 0.0.40
codegen_flags: <defaults>
</compile_context>

<pallas_src>
import math
from functools import partial

import jax
import jax.numpy as jnp
from jax.experimental import pallas as pl
from jax.experimental.pallas import tpu as pltpu


def _round_up(x, m):
    return (x + m - 1) // m * m


_SQRT_HALF = 0.7071067811865476  # 1/sqrt(2)


def _erf_fast(x):
    """Abramowitz & Stegun 7.1.26 rational approximation (|err| <= ~1.5e-7).

    Only exp / mul / add / select / EUP-reciprocal — all guaranteed to lower
    in Mosaic.  The divide is replaced with an approximate EUP reciprocal plus
    one Newton-Raphson step (cheaper than the exact-divide lowering, keeps
    f32-level accuracy).
    """
    a1, a2, a3, a4, a5 = (0.254829592, -0.284496736, 1.421413741,
                          -1.453152027, 1.061405429)
    p = 0.3275911
    ax = jnp.abs(x)
    d = 1.0 + p * ax
    t = pl.reciprocal(d, approx=True)
    t = t * (2.0 - d * t)                     # one NR step: near-exact 1/d
    poly = ((((a5 * t + a4) * t + a3) * t + a2) * t + a1) * t
    y = 1.0 - poly * jnp.exp(-(ax * ax))
    sgn = jnp.where(x < 0.0, -1.0, 1.0)       # fold sign with a multiply
    return sgn * y


def _gelu_exact(x):
    # Matches torch.nn.functional.gelu (approximate='none').
    return 0.5 * x * (1.0 + _erf_fast(x * _SQRT_HALF))


def geglu_ffn_kernel(x_ref, w1_ref, b1_ref, w2_ref, b2_ref, o_ref, *,
                     gate_dtype=None):
    # x_ref: (TR, D); w1_ref: (D, 2H); b1_ref: (1, 2H)
    # w2_ref: (H, D); b2_ref: (1, D);  o_ref: (TR, D)
    hidden = w2_ref.shape[0]

    # First projection on the MXU.  Cast the activation tile to the weight
    # dtype so bf16 weights take the full-rate bf16 MXU path (f32 accumulate)
    # instead of silently promoting both operands to the slow f32 path.
    h = jnp.dot(x_ref[...].astype(w1_ref.dtype), w1_ref[...],
                preferred_element_type=jnp.float32)
    h = h + b1_ref[...].astype(jnp.float32)

    # GEGLU: a, gates = chunk(h, 2, dim=-1); y = a * gelu(gates)
    a = h[:, :hidden]
    g = h[:, hidden:]
    if gate_dtype is not None:
        # Optional cheaper gate math (bf16 EUP/VPU on v6e/v7x).  Off by
        # default: exact-erf f32 gate matches the torch reference tightly.
        g = g.astype(gate_dtype)
    y = a * _gelu_exact(g).astype(jnp.float32)

    # Second projection on the MXU.
    out = jnp.dot(y.astype(w2_ref.dtype), w2_ref[...],
                  preferred_element_type=jnp.float32)
    out = out + b2_ref[...].astype(jnp.float32)
    o_ref[...] = out.astype(o_ref.dtype)
    # TODO(synk): for very large hidden (>= ~2-4K) add hidden-dim tiling
    # (second "arbitrary" grid axis + f32 accumulator) so W1/W2 stream and the
    # f32 intermediate stays bounded; not needed at AF2 widths.


def _vmem_capacity_bytes():
    try:
        info = pltpu.get_tpu_info()
        return int(getattr(info, "vmem_capacity_bytes", 64 * 1024 * 1024))
    except Exception:
        return 64 * 1024 * 1024  # conservative (v7x-sized) default


def feedforward_forward(x, w1, b1, w2, b2, *, row_tile=None, gate_dtype=None):
    """x: (..., dim) -> (..., dim).  w1: (dim, 2*hidden), w2: (hidden, dim)."""
    orig_shape = x.shape
    dim = orig_shape[-1]
    two_hidden = w1.shape[1]
    hidden = two_hidden // 2
    assert w1.shape == (dim, two_hidden)
    assert w2.shape == (hidden, dim)

    rows = math.prod(orig_shape[:-1])
    x2 = x.reshape(rows, dim)
    b1_2 = b1.reshape(1, two_hidden)
    b2_2 = b2.reshape(1, dim)

    act_bytes = x2.dtype.itemsize
    w_bytes = (w1.size * w1.dtype.itemsize + w2.size * w2.dtype.itemsize
               + b1.size * b1.dtype.itemsize + b2.size * b2.dtype.itemsize)

    # --- generation-aware row-tile selection --------------------------------
    vmem_cap = _vmem_capacity_bytes()
    budget = int(vmem_cap * 0.85)

    def footprint(tr):
        io = 2 * tr * dim * (act_bytes + act_bytes)     # x/out double-buffered
        inter = 3 * tr * two_hidden * 4                 # f32 h / y / headroom
        return io + w_bytes + inter + (2 << 20)         # + compiler scratch

    # Keep at least 2 grid steps so both v7x TensorCores get work.
    max_tr = _round_up(max(rows // 2, 8), 8) if rows >= 16 else 8
    if row_tile is not None:
        max_tr = min(max_tr, max(8, _round_up(row_tile, 8)))

    tr = 8
    for cand in (2048, 1024, 512, 256, 128, 64, 32, 16, 8):
        if cand <= max_tr and footprint(cand) <= budget:
            tr = cand
            break

    grid = (pl.cdiv(rows, tr),)  # ragged last tile: OOB rows never written

    fp = footprint(tr)
    vmem_limit = None
    if fp > 12 * 1024 * 1024:
        vmem_limit = int(min(vmem_cap * 9 // 10,
                             max(fp * 3 // 2, 32 * 1024 * 1024)))

    cost = pl.CostEstimate(
        flops=int(2 * rows * dim * two_hidden + 2 * rows * hidden * dim),
        transcendentals=int(2 * rows * hidden),  # exp + recip per gate element
        bytes_accessed=int(2 * rows * dim * act_bytes + w_bytes),
    )

    # TODO(synk): for dim < 128 (small head dims), pad the feature dim to 128
    # in the wrapper for lane-dense stores; skipped here to avoid extra HBM
    # round trips at these tiny demo shapes.

    def build_call(single_buffer_weights):
        if single_buffer_weights:
            def wspec(shape):
                # Constant index_map -> block never changes; single-buffer it
                # (halves resident-weight VMEM vs. default double buffering).
                return pl.BlockSpec(shape, lambda i: (0, 0),
                                    pipeline_mode=pl.Buffered(1))
        else:
            def wspec(shape):
                return pl.BlockSpec(shape, lambda i: (0, 0))

        return pl.pallas_call(
            partial(geglu_ffn_kernel, gate_dtype=gate_dtype),
            out_shape=jax.ShapeDtypeStruct((rows, dim), x.dtype),
            grid=grid,
            in_specs=[
                pl.BlockSpec((tr, dim), lambda i: (i, 0)),  # x row tile
                wspec((dim, two_hidden)),                   # W1 (resident)
                wspec((1, two_hidden)),                     # b1
                wspec((hidden, dim)),                       # W2 (resident)
                wspec((1, dim)),                            # b2
            ],
            out_specs=pl.BlockSpec((tr, dim), lambda i: (i, 0)),
            compiler_params=pltpu.CompilerParams(
                dimension_semantics=("parallel",),  # rows shard across TCs
                vmem_limit_bytes=vmem_limit,
            ),
            cost_estimate=cost,
        )

    try:
        out = jax.block_until_ready(build_call(True)(x2, w1, b1_2, w2, b2_2))
    except Exception:
        # Fallback if pipeline_mode=pl.Buffered(1) is rejected on this
        # jax/libtpu combination: default double-buffered weight blocks.
        out = build_call(False)(x2, w1, b1_2, w2, b2_2)

    return out.reshape(orig_shape)


def reference_forward(x, w1, b1, w2, b2):
    hidden = w2.shape[0]
    xf = x.astype(jnp.float32)
    h = xf @ w1.astype(jnp.float32) + b1.astype(jnp.float32)
    a, g = h[..., :hidden], h[..., hidden:]
    y = a * jax.nn.gelu(g, approximate=False)  # exact erf gelu (torch default)
    out = y @ w2.astype(jnp.float32) + b2.astype(jnp.float32)
    return out.astype(x.dtype)


if __name__ == "__main__":
    key = jax.random.PRNGKey(0)
    batch, seq, dim, mult = 2, 8, 32, 4
    hidden = dim * mult  # 128

    k_x, k_w1, k_b1, k_w2, k_b2 = jax.random.split(key, 5)
    x = jax.random.normal(k_x, (batch, seq, dim), dtype=jnp.float32)

    # net = Linear(dim, dim*mult*2) -> GEGLU -> Dropout(0.0) -> Linear(dim*mult, dim)
    w1 = jax.random.normal(k_w1, (dim, 2 * hidden), dtype=jnp.float32) / math.sqrt(dim)
    b1 = jax.random.normal(k_b1, (2 * hidden,), dtype=jnp.float32) * 0.01
    w2 = jax.random.normal(k_w2, (hidden, dim), dtype=jnp.float32) / math.sqrt(hidden)
    b2 = jax.random.normal(k_b2, (dim,), dtype=jnp.float32) * 0.01

    out = feedforward_forward(x, w1, b1, w2, b2)
    out = jax.block_until_ready(out)

    ref = reference_forward(x, w1, b1, w2, b2)
    assert out.shape == ref.shape
    assert jnp.allclose(out, ref, atol=1e-3, rtol=1e-3), "mismatch vs reference"

    print("KERNEL_OK")
</pallas_src>

<mosaic_0001>
module attributes {stable_mosaic.version = 11 : i64} {
  func.func @geglu_ffn_kernel(%arg0: i32, %arg1: memref<8x32xf32, #tpu.memory_space<vmem>>, %arg2: memref<32x256xf32, #tpu.memory_space<vmem>>, %arg3: memref<1x256xf32, #tpu.memory_space<vmem>>, %arg4: memref<128x32xf32, #tpu.memory_space<vmem>>, %arg5: memref<1x32xf32, #tpu.memory_space<vmem>>, %arg6: memref<8x32xf32, #tpu.memory_space<vmem>>) attributes {dimension_semantics = [#tpu.dimension_semantics<parallel>], iteration_bounds = array<i64: 2>, scalar_prefetch = 0 : i64, scratch_operands = 0 : i64, tpu.core_type = #tpu.core_type<tc>, window_params = [{transform_indices = @transform_0, window_bounds = array<i64: 8, 32>}, {pipeline_mode = #tpu.pipeline_mode<synchronous>, transform_indices = @transform_1, window_bounds = array<i64: 32, 256>}, {pipeline_mode = #tpu.pipeline_mode<synchronous>, transform_indices = @transform_2, window_bounds = array<i64: 1, 256>}, {pipeline_mode = #tpu.pipeline_mode<synchronous>, transform_indices = @transform_3, window_bounds = array<i64: 128, 32>}, {pipeline_mode = #tpu.pipeline_mode<synchronous>, transform_indices = @transform_4, window_bounds = array<i64: 1, 32>}, {transform_indices = @transform_5, window_bounds = array<i64: 8, 32>}]} {
    %c0 = arith.constant 0 : index
    %c0_0 = arith.constant 0 : index
    %0 = vector.load %arg1[%c0, %c0_0] : memref<8x32xf32, #tpu.memory_space<vmem>>, vector<8x32xf32>
    %c0_1 = arith.constant 0 : index
    %c0_2 = arith.constant 0 : index
    %1 = vector.load %arg2[%c0_1, %c0_2] : memref<32x256xf32, #tpu.memory_space<vmem>>, vector<32x256xf32>
    %cst = arith.constant dense<0.000000e+00> : vector<8x256xf32>
    %2 = tpu.matmul %0, %1, %cst {dimension_numbers = #tpu.dot_dimension_numbers<[1], [0], [0], [1], [0, 0, 1, 1], [], []>} : vector<8x32xf32>, vector<32x256xf32>, vector<8x256xf32> -> vector<8x256xf32>
    %c0_3 = arith.constant 0 : index
    %c0_4 = arith.constant 0 : index
    %3 = vector.load %arg3[%c0_3, %c0_4] : memref<1x256xf32, #tpu.memory_space<vmem>>, vector<1x256xf32>
    %4 = vector.broadcast %3 : vector<1x256xf32> to vector<8x256xf32>
    %5 = arith.addf %2, %4 : vector<8x256xf32>
    %6 = vector.extract_strided_slice %5 {offsets = [0, 0], sizes = [8, 128], strides = [1, 1]} : vector<8x256xf32> to vector<8x128xf32>
    %7 = vector.extract_strided_slice %5 {offsets = [0, 128], sizes = [8, 128], strides = [1, 1]} : vector<8x256xf32> to vector<8x128xf32>
    %cst_5 = arith.constant 5.000000e-01 : f32
    %8 = vector.broadcast %cst_5 : f32 to vector<8x128xf32>
    %9 = arith.mulf %8, %7 : vector<8x128xf32>
    %cst_6 = arith.constant 0.707106769 : f32
    %10 = vector.broadcast %cst_6 : f32 to vector<8x128xf32>
    %11 = arith.mulf %7, %10 : vector<8x128xf32>
    %12 = math.absf %11 : vector<8x128xf32>
    %cst_7 = arith.constant 0.327591091 : f32
    %13 = vector.broadcast %cst_7 : f32 to vector<8x128xf32>
    %14 = arith.mulf %13, %12 : vector<8x128xf32>
    %cst_8 = arith.constant 1.000000e+00 : f32
    %15 = vector.broadcast %cst_8 : f32 to vector<8x128xf32>
    %16 = arith.addf %15, %14 : vector<8x128xf32>
    %17 = tpu.reciprocal %16 {approx = true} : vector<8x128xf32> -> vector<8x128xf32>
    %18 = arith.mulf %16, %17 : vector<8x128xf32>
    %cst_9 = arith.constant 2.000000e+00 : f32
    %19 = vector.broadcast %cst_9 : f32 to vector<8x128xf32>
    %20 = arith.subf %19, %18 : vector<8x128xf32>
    %21 = arith.mulf %17, %20 : vector<8x128xf32>
    %cst_10 = arith.constant 1.06140542 : f32
    %22 = vector.broadcast %cst_10 : f32 to vector<8x128xf32>
    %23 = arith.mulf %22, %21 : vector<8x128xf32>
    %cst_11 = arith.constant -1.45315206 : f32
    %24 = vector.broadcast %cst_11 : f32 to vector<8x128xf32>
    %25 = arith.addf %23, %24 : vector<8x128xf32>
    %26 = arith.mulf %25, %21 : vector<8x128xf32>
    %cst_12 = arith.constant 1.42141378 : f32
    %27 = vector.broadcast %cst_12 : f32 to vector<8x128xf32>
    %28 = arith.addf %26, %27 : vector<8x128xf32>
    %29 = arith.mulf %28, %21 : vector<8x128xf32>
    %cst_13 = arith.constant -0.284496725 : f32
    %30 = vector.broadcast %cst_13 : f32 to vector<8x128xf32>
    %31 = arith.addf %29, %30 : vector<8x128xf32>
    %32 = arith.mulf %31, %21 : vector<8x128xf32>
    %cst_14 = arith.constant 0.254829586 : f32
    %33 = vector.broadcast %cst_14 : f32 to vector<8x128xf32>
    %34 = arith.addf %32, %33 : vector<8x128xf32>
    %35 = arith.mulf %34, %21 : vector<8x128xf32>
    %36 = arith.mulf %12, %12 : vector<8x128xf32>
    %cst_15 = arith.constant 0.000000e+00 : f32
    %37 = vector.broadcast %cst_15 : f32 to vector<8x128xf32>
    %38 = arith.subf %37, %36 : vector<8x128xf32>
    %39 = math.exp %38 : vector<8x128xf32>
    %40 = arith.mulf %35, %39 : vector<8x128xf32>
    %cst_16 = arith.constant 1.000000e+00 : f32
    %41 = vector.broadcast %cst_16 : f32 to vector<8x128xf32>
    %42 = arith.subf %41, %40 : vector<8x128xf32>
    %cst_17 = arith.constant 0.000000e+00 : f32
    %43 = vector.broadcast %cst_17 : f32 to vector<8x128xf32>
    %44 = arith.cmpf olt, %11, %43 : vector<8x128xf32>
    %cst_18 = arith.constant -1.000000e+00 : f32
    %cst_19 = arith.constant 1.000000e+00 : f32
    %45 = vector.broadcast %cst_18 : f32 to vector<8x128xf32>
    %46 = vector.broadcast %cst_19 : f32 to vector<8x128xf32>
    %47 = arith.select %44, %45, %46 : vector<8x128xi1>, vector<8x128xf32>
    %48 = arith.mulf %47, %42 : vector<8x128xf32>
    %cst_20 = arith.constant 1.000000e+00 : f32
    %49 = vector.broadcast %cst_20 : f32 to vector<8x128xf32>
    %50 = arith.addf %49, %48 : vector<8x128xf32>
    %51 = arith.mulf %9, %50 : vector<8x128xf32>
    %52 = arith.mulf %6, %51 : vector<8x128xf32>
    %c0_21 = arith.constant 0 : index
    %c0_22 = arith.constant 0 : index
    %53 = vector.load %arg4[%c0_21, %c0_22] : memref<128x32xf32, #tpu.memory_space<vmem>>, vector<128x32xf32>
    %cst_23 = arith.constant dense<0.000000e+00> : vector<8x32xf32>
    %54 = tpu.matmul %52, %53, %cst_23 {dimension_numbers = #tpu.dot_dimension_numbers<[1], [0], [0], [1], [0, 0, 1, 1], [], []>} : vector<8x128xf32>, vector<128x32xf32>, vector<8x32xf32> -> vector<8x32xf32>
    %c0_24 = arith.constant 0 : index
    %c0_25 = arith.constant 0 : index
    %55 = vector.load %arg5[%c0_24, %c0_25] : memref<1x32xf32, #tpu.memory_space<vmem>>, vector<1x32xf32>
    %56 = vector.broadcast %55 : vector<1x32xf32> to vector<8x32xf32>
    %57 = arith.addf %54, %56 : vector<8x32xf32>
    %c0_26 = arith.constant 0 : index
    %c0_27 = arith.constant 0 : index
    %58 = vector.load %arg6[%c0_26, %c0_27] : memref<8x32xf32, #tpu.memory_space<vmem>>, vector<8x32xf32>
    tpu.vector_store %arg6[%c0_26, %c0_27], %57 {strides = array<i32>} : memref<8x32xf32, #tpu.memory_space<vmem>>, vector<8x32xf32>,
    return
  }
  func.func @transform_0(%arg0: i32) -> (i32, i32) {
    %c0_i32 = arith.constant 0 : i32
    %c0_i32_0 = arith.constant 0 : i32
    return %arg0, %c0_i32 : i32, i32
  }
  func.func @transform_1(%arg0: i32) -> (i32, i32) {
    %c0_i32 = arith.constant 0 : i32
    %c0_i32_0 = arith.constant 0 : i32
    %c0_i32_1 = arith.constant 0 : i32
    return %c0_i32, %c0_i32_0 : i32, i32
  }
  func.func @transform_2(%arg0: i32) -> (i32, i32) {
    %c0_i32 = arith.constant 0 : i32
    %c0_i32_0 = arith.constant 0 : i32
    %c0_i32_1 = arith.constant 0 : i32
    return %c0_i32, %c0_i32_0 : i32, i32
  }
  func.func @transform_3(%arg0: i32) -> (i32, i32) {
    %c0_i32 = arith.constant 0 : i32
    %c0_i32_0 = arith.constant 0 : i32
    %c0_i32_1 = arith.constant 0 : i32
    return %c0_i32, %c0_i32_0 : i32, i32
  }
  func.func @transform_4(%arg0: i32) -> (i32, i32) {
    %c0_i32 = arith.constant 0 : i32
    %c0_i32_0 = arith.constant 0 : i32
    %c0_i32_1 = arith.constant 0 : i32
    return %c0_i32, %c0_i32_0 : i32, i32
  }
  func.func @transform_5(%arg0: i32) -> (i32, i32) {
    %c0_i32 = arith.constant 0 : i32
    %c0_i32_0 = arith.constant 0 : i32
    return %arg0, %c0_i32 : i32, i32
  }
}

module attributes {stable_mosaic.version = 11 : i64} {
  func.func @geglu_ffn_kernel(%arg0: i32, %arg1: memref<8x32xf32, #tpu.memory_space<vmem>>, %arg2: memref<32x256xf32, #tpu.memory_space<vmem>>, %arg3: memref<1x256xf32, #tpu.memory_space<vmem>>, %arg4: memref<128x32xf32, #tpu.memory_space<vmem>>, %arg5: memref<1x32xf32, #tpu.memory_space<vmem>>, %arg6: memref<8x32xf32, #tpu.memory_space<vmem>>) attributes {dimension_semantics = [#tpu.dimension_semantics<parallel>], iteration_bounds = array<i64: 2>, scalar_prefetch = 0 : i64, scratch_operands = 0 : i64, tpu.core_type = #tpu.core_type<tc>, window_params = [{transform_indices = @transform_0, window_bounds = array<i64: 8, 32>}, {pipeline_mode = #tpu.pipeline_mode<synchronous>, transform_indices = @transform_1, window_bounds = array<i64: 32, 256>}, {pipeline_mode = #tpu.pipeline_mode<synchronous>, transform_indices = @transform_2, window_bounds = array<i64: 1, 256>}, {pipeline_mode = #tpu.pipeline_mode<synchronous>, transform_indices = @transform_3, window_bounds = array<i64: 128, 32>}, {pipeline_mode = #tpu.pipeline_mode<synchronous>, transform_indices = @transform_4, window_bounds = array<i64: 1, 32>}, {transform_indices = @transform_5, window_bounds = array<i64: 8, 32>}]} {
    %c0 = arith.constant 0 : index
    %c0_0 = arith.constant 0 : index
    %0 = vector.load %arg1[%c0, %c0_0] : memref<8x32xf32, #tpu.memory_space<vmem>>, vector<8x32xf32>
    %c0_1 = arith.constant 0 : index
    %c0_2 = arith.constant 0 : index
    %1 = vector.load %arg2[%c0_1, %c0_2] : memref<32x256xf32, #tpu.memory_space<vmem>>, vector<32x256xf32>
    %cst = arith.constant dense<0.000000e+00> : vector<8x256xf32>
    %2 = tpu.matmul %0, %1, %cst {dimension_numbers = #tpu.dot_dimension_numbers<[1], [0], [0], [1], [0, 0, 1, 1], [], []>} : vector<8x32xf32>, vector<32x256xf32>, vector<8x256xf32> -> vector<8x256xf32>
    %c0_3 = arith.constant 0 : index
    %c0_4 = arith.constant 0 : index
    %3 = vector.load %arg3[%c0_3, %c0_4] : memref<1x256xf32, #tpu.memory_space<vmem>>, vector<1x256xf32>
    %4 = vector.broadcast %3 : vector<1x256xf32> to vector<8x256xf32>
    %5 = arith.addf %2, %4 : vector<8x256xf32>
    %6 = vector.extract_strided_slice %5 {offsets = [0, 0], sizes = [8, 128], strides = [1, 1]} : vector<8x256xf32> to vector<8x128xf32>
    %7 = vector.extract_strided_slice %5 {offsets = [0, 128], sizes = [8, 128], strides = [1, 1]} : vector<8x256xf32> to vector<8x128xf32>
    %cst_5 = arith.constant 5.000000e-01 : f32
    %8 = vector.broadcast %cst_5 : f32 to vector<8x128xf32>
    %9 = arith.mulf %8, %7 : vector<8x128xf32>
    %cst_6 = arith.constant 0.707106769 : f32
    %10 = vector.broadcast %cst_6 : f32 to vector<8x128xf32>
    %11 = arith.mulf %7, %10 : vector<8x128xf32>
    %12 = math.absf %11 : vector<8x128xf32>
    %cst_7 = arith.constant 0.327591091 : f32
    %13 = vector.broadcast %cst_7 : f32 to vector<8x128xf32>
    %14 = arith.mulf %13, %12 : vector<8x128xf32>
    %cst_8 = arith.constant 1.000000e+00 : f32
    %15 = vector.broadcast %cst_8 : f32 to vector<8x128xf32>
    %16 = arith.addf %15, %14 : vector<8x128xf32>
    %17 = tpu.reciprocal %16 {approx = true} : vector<8x128xf32> -> vector<8x128xf32>
    %18 = arith.mulf %16, %17 : vector<8x128xf32>
    %cst_9 = arith.constant 2.000000e+00 : f32
    %19 = vector.broadcast %cst_9 : f32 to vector<8x128xf32>
    %20 = arith.subf %19, %18 : vector<8x128xf32>
    %21 = arith.mulf %17, %20 : vector<8x128xf32>
    %cst_10 = arith.constant 1.06140542 : f32
    %22 = vector.broadcast %cst_10 : f32 to vector<8x128xf32>
    %23 = arith.mulf %22, %21 : vector<8x128xf32>
    %cst_11 = arith.constant -1.45315206 : f32
    %24 = vector.broadcast %cst_11 : f32 to vector<8x128xf32>
    %25 = arith.addf %23, %24 : vector<8x128xf32>
    %26 = arith.mulf %25, %21 : vector<8x128xf32>
    %cst_12 = arith.constant 1.42141378 : f32
    %27 = vector.broadcast %cst_12 : f32 to vector<8x128xf32>
    %28 = arith.addf %26, %27 : vector<8x128xf32>
    %29 = arith.mulf %28, %21 : vector<8x128xf32>
    %cst_13 = arith.constant -0.284496725 : f32
    %30 = vector.broadcast %cst_13 : f32 to vector<8x128xf32>
    %31 = arith.addf %29, %30 : vector<8x128xf32>
    %32 = arith.mulf %31, %21 : vector<8x128xf32>
    %cst_14 = arith.constant 0.254829586 : f32
    %33 = vector.broadcast %cst_14 : f32 to vector<8x128xf32>
    %34 = arith.addf %32, %33 : vector<8x128xf32>
    %35 = arith.mulf %34, %21 : vector<8x128xf32>
    %36 = arith.mulf %12, %12 : vector<8x128xf32>
    %cst_15 = arith.constant 0.000000e+00 : f32
    %37 = vector.broadcast %cst_15 : f32 to vector<8x128xf32>
    %38 = arith.subf %37, %36 : vector<8x128xf32>
    %39 = math.exp %38 : vector<8x128xf32>
    %40 = arith.mulf %35, %39 : vector<8x128xf32>
    %cst_16 = arith.constant 1.000000e+00 : f32
    %41 = vector.broadcast %cst_16 : f32 to vector<8x128xf32>
    %42 = arith.subf %41, %40 : vector<8x128xf32>
    %cst_17 = arith.constant 0.000000e+00 : f32
    %43 = vector.broadcast %cst_17 : f32 to vector<8x128xf32>
    %44 = arith.cmpf olt, %11, %43 : vector<8x128xf32>
    %cst_18 = arith.constant -1.000000e+00 : f32
    %cst_19 = arith.constant 1.000000e+00 : f32
    %45 = vector.broadcast %cst_18 : f32 to vector<8x128xf32>
    %46 = vector.broadcast %cst_19 : f32 to vector<8x128xf32>
    %47 = arith.select %44, %45, %46 : vector<8x128xi1>, vector<8x128xf32>
    %48 = arith.mulf %47, %42 : vector<8x128xf32>
    %cst_20 = arith.constant 1.000000e+00 : f32
    %49 = vector.broadcast %cst_20 : f32 to vector<8x128xf32>
    %50 = arith.addf %49, %48 : vector<8x128xf32>
    %51 = arith.mulf %9, %50 : vector<8x128xf32>
    %52 = arith.mulf %6, %51 : vector<8x128xf32>
    %c0_21 = arith.constant 0 : index
    %c0_22 = arith.constant 0 : index
    %53 = vector.load %arg4[%c0_21, %c0_22] : memref<128x32xf32, #tpu.memory_space<vmem>>, vector<128x32xf32>
    %cst_23 = arith.constant dense<0.000000e+00> : vector<8x32xf32>
    %54 = tpu.matmul %52, %53, %cst_23 {dimension_numbers = #tpu.dot_dimension_numbers<[1], [0], [0], [1], [0, 0, 1, 1], [], []>} : vector<8x128xf32>, vector<128x32xf32>, vector<8x32xf32> -> vector<8x32xf32>
    %c0_24 = arith.constant 0 : index
    %c0_25 = arith.constant 0 : index
    %55 = vector.load %arg5[%c0_24, %c0_25] : memref<1x32xf32, #tpu.memory_space<vmem>>, vector<1x32xf32>
    %56 = vector.broadcast %55 : vector<1x32xf32> to vector<8x32xf32>
    %57 = arith.addf %54, %56 : vector<8x32xf32>
    %c0_26 = arith.constant 0 : index
    %c0_27 = arith.constant 0 : index
    %58 = vector.load %arg6[%c0_26, %c0_27] : memref<8x32xf32, #tpu.memory_space<vmem>>, vector<8x32xf32>
    tpu.vector_store %arg6[%c0_26, %c0_27], %57 {strides = array<i32>} : memref<8x32xf32, #tpu.memory_space<vmem>>, vector<8x32xf32>,
    return
  }
  func.func @transform_0(%arg0: i32) -> (i32, i32) {
    %c0_i32 = arith.constant 0 : i32
    %c0_i32_0 = arith.constant 0 : i32
    return %arg0, %c0_i32 : i32, i32
  }
  func.func @transform_1(%arg0: i32) -> (i32, i32) {
    %c0_i32 = arith.constant 0 : i32
    %c0_i32_0 = arith.constant 0 : i32
    %c0_i32_1 = arith.constant 0 : i32
    return %c0_i32, %c0_i32_0 : i32, i32
  }
  func.func @transform_2(%arg0: i32) -> (i32, i32) {
    %c0_i32 = arith.constant 0 : i32
    %c0_i32_0 = arith.constant 0 : i32
    %c0_i32_1 = arith.constant 0 : i32
    return %c0_i32, %c0_i32_0 : i32, i32
  }
  func.func @transform_3(%arg0: i32) -> (i32, i32) {
    %c0_i32 = arith.constant 0 : i32
    %c0_i32_0 = arith.constant 0 : i32
    %c0_i32_1 = arith.constant 0 : i32
    return %c0_i32, %c0_i32_0 : i32, i32
  }
  func.func @transform_4(%arg0: i32) -> (i32, i32) {
    %c0_i32 = arith.constant 0 : i32
    %c0_i32_0 = arith.constant 0 : i32
    %c0_i32_1 = arith.constant 0 : i32
    return %c0_i32, %c0_i32_0 : i32, i32
  }
  func.func @transform_5(%arg0: i32) -> (i32, i32) {
    %c0_i32 = arith.constant 0 : i32
    %c0_i32_0 = arith.constant 0 : i32
    return %arg0, %c0_i32 : i32, i32
  }
}

</mosaic_0001>

<bundles_post_ra>
// kernel: tpu_custom_call.1
= control target key start
LH: loop header
LB: loop body
LE: loop exit
PB: predicated region body
PF: predicated region fallthrough
CT: control target
= control target key end

     0   :  { %10 = vsyncpa [#allocation3], 0  ;;  %s935_s0 = inlined_call_operand.vmem [shape: f32[16,32], index: 0, kind: input, shape index: {}]   ;;  %s936_s1 = inlined_call_operand.vmem [shape: f32[32,256], index: 1, kind: input, shape index: {}]   ;;  %s937_s2 = inlined_call_operand.vmem [shape: f32[1,256], index: 2, kind: input, shape index: {}]   ;;  %s938_s3 = inlined_call_operand.vmem [shape: f32[128,32], index: 3, kind: input, shape index: {}]   ;;  %s939_s4 = inlined_call_operand.vmem [shape: f32[1,32], index: 4, kind: input, shape index: {}]   ;;  %s940_s5 = inlined_call_operand.hbm [shape: f32[16,32], index: 5, kind: output, shape index: {}]  }
   0x1   :  { %12 = vsyncpa [#allocation3 + $0x1], 0  ;;  %s755_s18 = smov 0   ;;  %s757_s19 = smov 0  }
   0x2   :  { %s759_s20 = smov 0   ;;  %s761_s21 = smov 0  }
   0x3 LB: > { %s776_s22 = sadd.s32 4294967295, %s718_s21   ;;  %s513_s23 = sadd.s32 4294967294, %s718_s21   ;;  %s718_s21 = sphi %s761_s21, %s946_s21   ;;  %s714_s20 = sphi %s759_s20, %s945_s20   ;;  %s710_s19 = sphi %s757_s19, %s944_s19   ;;  %s706_s18 = sphi %s755_s18, %s943_s18  }
   0x4   : > { %s780_s24 = sadd.s32 1, %s718_s21   ;;  %s135_s25 = sadd.s32 1, %s714_s20 }
   0x5   : > { %s132_s26 = ssub.s32 %s718_s21, %s780_s24  ;;  %p145_p0 = scmp.ne.s32.totalorder %s714_s20, %s710_s19 }
   0x6   : > { %p133_p1 = scmp.eq.s32.totalorder %s132_s26, 0  ;;  %p146_p2 = scmp.eq.s32.totalorder %s776_s22, 1 }
   0x7   : > { %p151_p3 = scmp.ne.s32.totalorder %s710_s19, %s706_s18  ;;  %p152_p4 = scmp.eq.s32.totalorder %s513_s23, 1 }
   0x8   : > { %s791_s27 = scalar_select %p133_p1, %s714_s20, %s135_s25  }
   0x9   : > { %p793_p5 = por %p146_p2, %p145_p0  ;;  %p797_p6 = por %p152_p4, %p151_p3 }
   0xa   : > { %p516_p7 = scmp.ge.s32.totalorder %s718_s21, 1  ;;  %p189_p8 = scmp.lt.s32.totalorder %s718_s21, 3 }
   0xc   : > { %p190_p9 = pnand %p516_p7, %p189_p8 }
   0xd   : > { %v222_v0 = vld [vmem:[%s936_s1 + $0x8] sm:$0xff] (!%p190_p9)  ;;  %v224_v1 = vld [vmem:[%s936_s1 + $0x18] sm:$0xff] (!%p190_p9)  ;;  %v221_v2 = vld [vmem:[%s936_s1] sm:$0xff] (!%p190_p9)  ;;  %p216_p10 = scmp.lt.s32.totalorder (!%p190_p9), %s776_s22, 1  ;;  %v720_v7 = vmov (!%p190_p9), 0.0   ;;  %vm241_vm0 = vcmask (!%p190_p9), 261120   ;;  %v231_v39 = vlaneseq (!%p190_p9) }
   0xe   : > { %193 = sbr.rel (%p190_p9) target bundleno = 524 (0x20c), region = 40  ;;  %v577_v3 = vpack.c.bf16 (!%p190_p9), %v224_v1, %v222_v0  ;;  %v223_v4 = vld [vmem:[%s936_s1 + $0x10] sm:$0xff] (!%p190_p9)  ;;  %v226_v5 = vld [vmem:[%s936_s1 + $0x28] sm:$0xff] (!%p190_p9)  ;;  %v228_v6 = vld [vmem:[%s936_s1 + $0x38] sm:$0xff] (!%p190_p9)  ;;  %309 = vmatprep.mubr.f32.mxu0 (!%p190_p9), %v720_v7  ;;  %v721_v17 = vmov (!%p190_p9), 0.0|0.0   ;;  %vm722_vm1 = vmmov (!%p190_p9), 0  }
   0xf   : > { %v579_v8 = vpack.c.bf16 (!%p190_p9), %v223_v4, %v221_v2  ;;  %v581_v9 = vpack.c.bf16 (!%p190_p9), %v228_v6, %v226_v5  ;;  %v225_v10 = vld [vmem:[%s936_s1 + $0x20] sm:$0xff] (!%p190_p9)  ;;  %v227_v11 = vld [vmem:[%s936_s1 + $0x30] sm:$0xff] (!%p190_p9)  ;;  %v347_v15 = vld [vmem:[%s938_s3 + $0x8] sm:$0xff] (!%p190_p9)  ;;  %585 = vmatprep.subr.bf16.mxu1 (!%p190_p9), %v721_v17  ;;  %574 = vmatprep.mubr.msk.f32.mxu1 (!%p190_p9), %vm722_vm1, %v720_v7  ;;  %v232_v40 = vshrl.u32 (!%p190_p9), %v231_v39, 7  ;;  %v723_v7 = vmov (!%p190_p9), 1.0   ;;  %s213_s12 = sand.u32 (!%p190_p9), 1, %s710_s19  }
  0x10   : > { %578 = vmatprep.subr.bf16.mxu0 (!%p190_p9), %v577_v3  ;;  %v583_v12 = vpack.c.bf16 (!%p190_p9), %v227_v11, %v225_v10  ;;  %v346_v14 = vld [vmem:[%s938_s3] sm:$0xff] (!%p190_p9)  ;;  %v348_v18 = vld [vmem:[%s938_s3 + $0x10] sm:$0xff] (!%p190_p9)  ;;  %v349_v19 = vld [vmem:[%s938_s3 + $0x18] sm:$0xff] (!%p190_p9)  ;;  %s517_s13 = sshll.u32 (!%p190_p9), %s213_s12, 3  ;;  %s522_s16 = sshll.u32 (!%p190_p9), %s776_s22, 7 }
  0x11   : > { %580 = vmatpush1.bf16.msra.mxu0 (!%p190_p9), %v579_v8  ;;  %v586_v16 = vpack.c.bf16 (!%p190_p9), %v347_v15, %v346_v14  ;;  %v589_v20 = vpack.c.bf16 (!%p190_p9), %v349_v19, %v348_v18  ;;  %v350_v21 = vld [vmem:[%s938_s3 + $0x20] sm:$0xff] (!%p190_p9)  ;;  %v351_v22 = vld [vmem:[%s938_s3 + $0x28] sm:$0xff] (!%p190_p9)  ;;  %v352_v24 = vld [vmem:[%s938_s3 + $0x30] sm:$0xff] (!%p190_p9)  ;;  %v237_v41 = vsub.s32 (!%p190_p9), 1, %v232_v40  ;;  %v233_v4 = vsub.s32 (!%p190_p9), 0, %v232_v40  ;;  %s215_s17 = scalar_lea.vmem (!%p190_p9), [#allocation2], %s517_s13 }
  0x12   : > { %582 = vmatprep.subr.bf16.mxu0 (!%p190_p9), %v581_v9  ;;  %v592_v23 = vpack.c.bf16 (!%p190_p9), %v351_v22, %v350_v21  ;;  %v353_v25 = vld [vmem:[%s938_s3 + $0x38] sm:$0xff] (!%p190_p9)  ;;  %v354_v27 = vld [vmem:[%s938_s3 + $0x40] sm:$0xff] (!%p190_p9)  ;;  %v355_v28 = vld [vmem:[%s938_s3 + $0x48] sm:$0xff] (!%p190_p9)  ;;  %s454_s23 = sshll.u32 (!%p190_p9), %s215_s17, 4  ;;  %s894_s23 = int_to_ptr.vmem [resolvable:$true] %s454_s23 }
  0x13   : > { %587 = vmatpush3.bf16.msra.mxu1 (!%p190_p9), %v586_v16  ;;  %v595_v26 = vpack.c.bf16 (!%p190_p9), %v353_v25, %v352_v24  ;;  %v598_v29 = vpack.c.bf16 (!%p190_p9), %v355_v28, %v354_v27  ;;  %v356_v30 = vld [vmem:[%s938_s3 + $0x50] sm:$0xff] (!%p190_p9)  ;;  %v357_v31 = vld [vmem:[%s938_s3 + $0x58] sm:$0xff] (!%p190_p9)  ;;  %v358_v33 = vld [vmem:[%s938_s3 + $0x60] sm:$0xff] (!%p190_p9)  ;;  %s656_s7 = scalar_lea.vmem (!%p190_p9), %s894_s23, 128 }
  0x14   : > { %588 = vmatprep.subr.bf16.mxu1 (!%p190_p9), %v721_v17  ;;  %v601_v32 = vpack.c.bf16 (!%p190_p9), %v357_v31, %v356_v30  ;;  %v359_v34 = vld [vmem:[%s938_s3 + $0x68] sm:$0xff] (!%p190_p9)  ;;  %v360_v36 = vld [vmem:[%s938_s3 + $0x70] sm:$0xff] (!%p190_p9)  ;;  %v361_v37 = vld [vmem:[%s938_s3 + $0x78] sm:$0xff] (!%p190_p9)  ;;  %p657_p11 = scmp.ne.s32.totalorder (!%p190_p9), %s894_s23, %s656_s7 }
  0x15   : > { %s217_s30 = scalar_select %p216_p10, %s776_s22, 1  ;;  %584 = vmatpush1.bf16.msra.mxu0 %v583_v12  ;;  %v604_v35 = vpack.c.bf16 %v359_v34, %v358_v33  ;;  %v607_v38 = vpack.c.bf16 %v361_v37, %v360_v36  ;;  %v229_v42 = vld [vmem:[%s937_s2] sm:$0x3] }
  0x16   : > { %v238_v43 = vrot.slane %v229_v42, %v237_v41  ;;  %v234_v9 = vrot.slane %v229_v42, %v233_v4  ;;  %v520_v16 = vld [vmem:[%s939_s4] ss:$0 sm:$0xff]  ;;  %p658_p12 = pnand %p657_p11, %p793_p5  ;;  %s724_s22 = smov [#allocation2]  }
  0x17   : > { %s518_s6 = sshll.u32 %s217_s30, 3  ;;  %590 = vmatpush3.bf16.msra.mxu1 %v589_v20  ;;  %s892_s30 = scalar_lea.hbm %s940_s5, %s522_s16 }
  0x18   : > { %s219_s9 = scalar_lea.vmem %s935_s0, %s518_s6  ;;  %591 = vmatprep.subr.bf16.mxu1 %v721_v17  ;;  %s441_s6 = scalar_lea.sflag [#allocation3], %s213_s12 }
  0x19   : > { %v220_v13 = vld [vmem:[%s219_s9] sm:$0xff]  ;;  %p659_p13 = pneg %p658_p12  ;;  %s660_s8 = sshll.u32 %s724_s22, 4  ;;  %s661_s8 = int_to_ptr.vmem [resolvable:$false] %s660_s8 }
  0x1a   : > { %519 = vmatmul.mubr.msk.f32.vlgmr.msra.gmra.mrb[0].mxu0 %vm241_vm0, %v220_v13  ;;  %s662_s9 = scalar_lea.vmem %s661_s8, 256  ;;  %p663_p0 = scmp.lt.s32.totalorder %s894_s23, %s661_s8 }
  0x1b   : > { %593 = vmatpush3.bf16.msra.mxu1 %v592_v23  ;;  %p664_p1 = scmp.lt.s32.totalorder %s662_s9, %s656_s7 }
  0x1c   : > { %594 = vmatprep.subr.bf16.mxu1 %v721_v17 }
  0x1d   : > { %p665_p2 = por %p664_p1, %p663_p0 }
  0x1f   : > { %596 = vmatpush3.bf16.msra.mxu1 %v595_v26  ;;  %p666_p3 = pnand %p665_p2, %p659_p13 }
  0x20   : > { %597 = vmatprep.subr.bf16.mxu1 %v721_v17 }
  0x23   : > { %599 = vmatpush3.bf16.msra.mxu1 %v598_v29 }
  0x24   : > { %600 = vmatprep.subr.bf16.mxu1 %v721_v17 }
  0x27   : > { %602 = vmatpush3.bf16.msra.mxu1 %v601_v32 }
  0x28   : > { %603 = vmatprep.subr.bf16.mxu1 %v721_v17 }
  0x2b   : > { %605 = vmatpush3.bf16.msra.mxu1 %v604_v35 }
  0x2c   : > { %606 = vmatprep.subr.bf16.mxu1 %v721_v17 }
  0x2f   : > { %608 = vmatpush3.bf16.msra.mxu1 %v607_v38 }
  0xed   : > { %v311_v44 = vpop.f32.mrb[0].mxu0 }
  0xee   : > { %v313_v45 = vpop.f32.mrb[1].mxu0  ;;  %v312_v13 = vadd.f32 %v311_v44, %v234_v9 }
  0xef   : > { %v314_v46 = vadd.f32 %v313_v45, %v238_v43 }
  0xf1   : > { %v317_v47 = vmul.f32 0.70710677, %v314_v46  ;;  %v316_v11 = vmul.f32 0.5, %v314_v46 }
  0xf3   : > { %v318_v48 = vand.u32 2147483647, %v317_v47  ;;  %vm340_vm2 = vcmp.lt.f32.partialorder %v317_v47, 0.0 }
  0xf4   : > { %v341_v8 = vsel %vm340_vm2, -1.0, %v723_v7 }
  0xf5   : > { %v319_v49 = vmul.f32 0.3275911, %v318_v48  ;;  %v334_v53 = vmul.f32 %v318_v48, %v318_v48 }
  0xf7   : > { %v320_v50 = vadd.f32 1.0, %v319_v49  ;;  %v335_v56 = vsub.f32 0.0, %v334_v53 }
  0xf9   : > { %652 = vrcp.f32 %v320_v50  ;;  %v336_v59 = vmul.f32 1.442695, %v335_v56 }
  0xfb   : > { %654 = vpow2.f32 %v336_v59 }
 0x103   : > { %v653_v51 = vpop.eup %652 }
 0x104   : > { %v322_v52 = vmul.f32 %v653_v51, %v320_v50 }
 0x105   : > { %v655_v3 = vpop.eup %654 }
 0x106   : > { %v323_v54 = vsub.f32 2.0, %v322_v52 }
 0x108   : > { %v324_v55 = vmul.f32 %v653_v51, %v323_v54 }
 0x10a   : > { %v325_v57 = vmul.f32 1.0614054, %v324_v55 }
 0x10c   : > { %v326_v58 = vadd.f32 -1.4531521, %v325_v57 }
 0x10e   : > { %v327_v60 = vmul.f32 %v326_v58, %v324_v55 }
 0x110   : > { %v328_v61 = vadd.f32 1.4214138, %v327_v60 }
 0x112   : > { %v329_v62 = vmul.f32 %v328_v61, %v324_v55 }
 0x114   : > { %v330_v63 = vadd.f32 -0.28449672, %v329_v62 }
 0x116   : > { %v331_v0 = vmul.f32 %v330_v63, %v324_v55 }
 0x118   : > { %v332_v1 = vadd.f32 0.2548296, %v331_v0 }
 0x11a   : > { %v333_v2 = vmul.f32 %v332_v1, %v324_v55 }
 0x11c   : > { %v338_v5 = vmul.f32 %v655_v3, %v333_v2 }
 0x11e   : > { %v339_v6 = vsub.f32 1.0, %v338_v5 }
 0x120   : > { %v342_v10 = vmul.f32 %v341_v8, %v339_v6 }
 0x122   : > { %v343_v12 = vadd.f32 1.0, %v342_v10 }
 0x124   : > { %v344_v14 = vmul.f32 %v343_v12, %v316_v11 }
 0x126   : > { %v345_v15 = vmul.f32 %v344_v14, %v312_v13 }
 0x128   : > { %575 = vmatmul.mubr.f32.vlgmr.msra.gmra.mrb[0].mxu1 %v345_v15 }
 0x1fb   : > { %v435_v17 = vpop.f32.mrb[0].mxu1 }
 0x1fc   : > { %v436_v18 = vadd.f32 %v520_v16, %v435_v17  ;;  %v576_v19 = vpop.f32.mrb[1].mxu1 }
 0x1fe   : > { %439 = vst.msk [vmem:[%s215_s17] sm:$0xff] %vm241_vm0, %v436_v18 }
 0x1ff   : > { %669 = shalt.err (!%p666_p3)
}
 0x200   : > { %s670_s10 = scalar_lea.hbm %s892_s30, 128  ;;  %s674_s13 = scalar_lea.hbm %s940_s5, 256 }
 0x201   : > { %p671_p4 = scmp.ne.s32.totalorder %s892_s30, %s670_s10  ;;  %p675_p9 = scmp.lt.u32.totalorder %s892_s30, %s940_s5 }
 0x202   : > { %p676_p10 = scmp.lt.u32.totalorder %s674_s13, %s670_s10  ;;  %p678_p12 = scmp.lt.u32.totalorder %s670_s10, %s892_s30 }
 0x203   : > { %p672_p7 = pnand %p671_p4, %p793_p5 }
 0x204   : > { %p677_p11 = por %p676_p10, %p675_p9 }
 0x205   : > { %p673_p8 = pneg %p672_p7 }
 0x206   : > { %p679_p13 = por %p678_p12, %p677_p11 }
 0x208   : > { %p680_p0 = pnand %p679_p13, %p673_p8 }
 0x20a   : > { %683 = shalt.err (!%p680_p0)
}
 0x20b   : > { %609 = dma.vmem_to_hbm [thread:$0]  (%p793_p5), %s894_s23, 128, %s892_s30, %s441_s6  }
 0x20c PF: > { %p615_p1 = scmp.ge.s32.totalorder %s718_s21, 2  ;;  %s466_s16 = sand.u32 1, %s706_s18  }
 0x20d   : > { %s467_s17 = scalar_lea.sflag [#allocation3], %s466_s16 }
 0x20e   : > { %p612_p2 = pnand %p615_p1, %p797_p6 }
 0x210   : > { %701 = dma.done.wait (!%p612_p2), %s467_s17, 128  }
 0x211   : > { %703 = vsyncadd (!%p612_p2), %s467_s17, 4294967168  ;;  %p15_p3 = scmp.ge.s32.totalorder %s780_s24, 4   ;;  %s943_s18 = smov %s710_s19 }
 0x212   : > { %s944_s19 = smov %s714_s20  ;;  %s945_s20 = smov %s791_s27 }
 0x213   : > { %s946_s21 = smov %s780_s24  ;;  %17 = sbr.rel (!%p15_p3) target bundleno = 3 (0x3), region = 75 }
 0x21a   :  { %472 = vsyncpa [#allocation3], 1 }
 0x21b   :  { %474 = vsyncpa [#allocation3 + $0x1], 1 }

// kernel: tpu_custom_call.1
= control target key start
LH: loop header
LB: loop body
LE: loop exit
PB: predicated region body
PF: predicated region fallthrough
CT: control target
= control target key end

     0   :  { %10 = vsyncpa [#allocation3], 0  ;;  %s935_s0 = inlined_call_operand.vmem [shape: f32[16,32], index: 0, kind: input, shape index: {}]   ;;  %s936_s1 = inlined_call_operand.vmem [shape: f32[32,256], index: 1, kind: input, shape index: {}]   ;;  %s937_s2 = inlined_call_operand.vmem [shape: f32[1,256], index: 2, kind: input, shape index: {}]   ;;  %s938_s3 = inlined_call_operand.vmem [shape: f32[128,32], index: 3, kind: input, shape index: {}]   ;;  %s939_s4 = inlined_call_operand.vmem [shape: f32[1,32], index: 4, kind: input, shape index: {}]   ;;  %s940_s5 = inlined_call_operand.hbm [shape: f32[16,32], index: 5, kind: output, shape index: {}]  }
   0x1   :  { %12 = vsyncpa [#allocation3 + $0x1], 0  ;;  %s755_s18 = smov 0   ;;  %s757_s19 = smov 0  }
   0x2   :  { %s759_s20 = smov 0   ;;  %s761_s21 = smov 0  }
   0x3 LB: > { %s776_s22 = sadd.s32 4294967295, %s718_s21   ;;  %s513_s23 = sadd.s32 4294967294, %s718_s21   ;;  %s718_s21 = sphi %s761_s21, %s946_s21   ;;  %s714_s20 = sphi %s759_s20, %s945_s20   ;;  %s710_s19 = sphi %s757_s19, %s944_s19   ;;  %s706_s18 = sphi %s755_s18, %s943_s18  }
   0x4   : > { %s780_s24 = sadd.s32 1, %s718_s21   ;;  %s135_s25 = sadd.s32 1, %s714_s20 }
   0x5   : > { %s132_s26 = ssub.s32 %s718_s21, %s780_s24  ;;  %p145_p0 = scmp.ne.s32.totalorder %s714_s20, %s710_s19 }
   0x6   : > { %p133_p1 = scmp.eq.s32.totalorder %s132_s26, 0  ;;  %p146_p2 = scmp.eq.s32.totalorder %s776_s22, 1 }
   0x7   : > { %p151_p3 = scmp.ne.s32.totalorder %s710_s19, %s706_s18  ;;  %p152_p4 = scmp.eq.s32.totalorder %s513_s23, 1 }
   0x8   : > { %s791_s27 = scalar_select %p133_p1, %s714_s20, %s135_s25  }
   0x9   : > { %p793_p5 = por %p146_p2, %p145_p0  ;;  %p797_p6 = por %p152_p4, %p151_p3 }
   0xa   : > { %p516_p7 = scmp.ge.s32.totalorder %s718_s21, 1  ;;  %p189_p8 = scmp.lt.s32.totalorder %s718_s21, 3 }
   0xc   : > { %p190_p9 = pnand %p516_p7, %p189_p8 }
   0xd   : > { %v222_v0 = vld [vmem:[%s936_s1 + $0x8] sm:$0xff] (!%p190_p9)  ;;  %v224_v1 = vld [vmem:[%s936_s1 + $0x18] sm:$0xff] (!%p190_p9)  ;;  %v221_v2 = vld [vmem:[%s936_s1] sm:$0xff] (!%p190_p9)  ;;  %p216_p10 = scmp.lt.s32.totalorder (!%p190_p9), %s776_s22, 1  ;;  %v720_v7 = vmov (!%p190_p9), 0.0   ;;  %vm241_vm0 = vcmask (!%p190_p9), 261120   ;;  %v231_v39 = vlaneseq (!%p190_p9) }
   0xe   : > { %193 = sbr.rel (%p190_p9) target bundleno = 524 (0x20c), region = 40  ;;  %v577_v3 = vpack.c.bf16 (!%p190_p9), %v224_v1, %v222_v0  ;;  %v223_v4 = vld [vmem:[%s936_s1 + $0x10] sm:$0xff] (!%p190_p9)  ;;  %v226_v5 = vld [vmem:[%s936_s1 + $0x28] sm:$0xff] (!%p190_p9)  ;;  %v228_v6 = vld [vmem:[%s936_s1 + $0x38] sm:$0xff] (!%p190_p9)  ;;  %309 = vmatprep.mubr.f32.mxu0 (!%p190_p9), %v720_v7  ;;  %v721_v17 = vmov (!%p190_p9), 0.0|0.0   ;;  %vm722_vm1 = vmmov (!%p190_p9), 0  }
   0xf   : > { %v579_v8 = vpack.c.bf16 (!%p190_p9), %v223_v4, %v221_v2  ;;  %v581_v9 = vpack.c.bf16 (!%p190_p9), %v228_v6, %v226_v5  ;;  %v225_v10 = vld [vmem:[%s936_s1 + $0x20] sm:$0xff] (!%p190_p9)  ;;  %v227_v11 = vld [vmem:[%s936_s1 + $0x30] sm:$0xff] (!%p190_p9)  ;;  %v347_v15 = vld [vmem:[%s938_s3 + $0x8] sm:$0xff] (!%p190_p9)  ;;  %585 = vmatprep.subr.bf16.mxu1 (!%p190_p9), %v721_v17  ;;  %574 = vmatprep.mubr.msk.f32.mxu1 (!%p190_p9), %vm722_vm1, %v720_v7  ;;  %v232_v40 = vshrl.u32 (!%p190_p9), %v231_v39, 7  ;;  %v723_v7 = vmov (!%p190_p9), 1.0   ;;  %s213_s12 = sand.u32 (!%p190_p9), 1, %s710_s19  }
  0x10   : > { %578 = vmatprep.subr.bf16.mxu0 (!%p190_p9), %v577_v3  ;;  %v583_v12 = vpack.c.bf16 (!%p190_p9), %v227_v11, %v225_v10  ;;  %v346_v14 = vld [vmem:[%s938_s3] sm:$0xff] (!%p190_p9)  ;;  %v348_v18 = vld [vmem:[%s938_s3 + $0x10] sm:$0xff] (!%p190_p9)  ;;  %v349_v19 = vld [vmem:[%s938_s3 + $0x18] sm:$0xff] (!%p190_p9)  ;;  %s517_s13 = sshll.u32 (!%p190_p9), %s213_s12, 3  ;;  %s522_s16 = sshll.u32 (!%p190_p9), %s776_s22, 7 }
  0x11   : > { %580 = vmatpush1.bf16.msra.mxu0 (!%p190_p9), %v579_v8  ;;  %v586_v16 = vpack.c.bf16 (!%p190_p9), %v347_v15, %v346_v14  ;;  %v589_v20 = vpack.c.bf16 (!%p190_p9), %v349_v19, %v348_v18  ;;  %v350_v21 = vld [vmem:[%s938_s3 + $0x20] sm:$0xff] (!%p190_p9)  ;;  %v351_v22 = vld [vmem:[%s938_s3 + $0x28] sm:$0xff] (!%p190_p9)  ;;  %v352_v24 = vld [vmem:[%s938_s3 + $0x30] sm:$0xff] (!%p190_p9)  ;;  %v237_v41 = vsub.s32 (!%p190_p9), 1, %v232_v40  ;;  %v233_v4 = vsub.s32 (!%p190_p9), 0, %v232_v40  ;;  %s215_s17 = scalar_lea.vmem (!%p190_p9), [#allocation2], %s517_s13 }
  0x12   : > { %582 = vmatprep.subr.bf16.mxu0 (!%p190_p9), %v581_v9  ;;  %v592_v23 = vpack.c.bf16 (!%p190_p9), %v351_v22, %v350_v21  ;;  %v353_v25 = vld [vmem:[%s938_s3 + $0x38] sm:$0xff] (!%p190_p9)  ;;  %v354_v27 = vld [vmem:[%s938_s3 + $0x40] sm:$0xff] (!%p190_p9)  ;;  %v355_v28 = vld [vmem:[%s938_s3 + $0x48] sm:$0xff] (!%p190_p9)  ;;  %s454_s23 = sshll.u32 (!%p190_p9), %s215_s17, 4  ;;  %s894_s23 = int_to_ptr.vmem [resolvable:$true] %s454_s23 }
  0x13   : > { %587 = vmatpush3.bf16.msra.mxu1 (!%p190_p9), %v586_v16  ;;  %v595_v26 = vpack.c.bf16 (!%p190_p9), %v353_v25, %v352_v24  ;;  %v598_v29 = vpack.c.bf16 (!%p190_p9), %v355_v28, %v354_v27  ;;  %v356_v30 = vld [vmem:[%s938_s3 + $0x50] sm:$0xff] (!%p190_p9)  ;;  %v357_v31 = vld [vmem:[%s938_s3 + $0x58] sm:$0xff] (!%p190_p9)  ;;  %v358_v33 = vld [vmem:[%s938_s3 + $0x60] sm:$0xff] (!%p190_p9)  ;;  %s656_s7 = scalar_lea.vmem (!%p190_p9), %s894_s23, 128 }
  0x14   : > { %588 = vmatprep.subr.bf16.mxu1 (!%p190_p9), %v721_v17  ;;  %v601_v32 = vpack.c.bf16 (!%p190_p9), %v357_v31, %v356_v30  ;;  %v359_v34 = vld [vmem:[%s938_s3 + $0x68] sm:$0xff] (!%p190_p9)  ;;  %v360_v36 = vld [vmem:[%s938_s3 + $0x70] sm:$0xff] (!%p190_p9)  ;;  %v361_v37 = vld [vmem:[%s938_s3 + $0x78] sm:$0xff] (!%p190_p9)  ;;  %p657_p11 = scmp.ne.s32.totalorder (!%p190_p9), %s894_s23, %s656_s7 }
  0x15   : > { %s217_s30 = scalar_select %p216_p10, %s776_s22, 1  ;;  %584 = vmatpush1.bf16.msra.mxu0 %v583_v12  ;;  %v604_v35 = vpack.c.bf16 %v359_v34, %v358_v33  ;;  %v607_v38 = vpack.c.bf16 %v361_v37, %v360_v36  ;;  %v229_v42 = vld [vmem:[%s937_s2] sm:$0x3] }
  0x16   : > { %v238_v43 = vrot.slane %v229_v42, %v237_v41  ;;  %v234_v9 = vrot.slane %v229_v42, %v233_v4  ;;  %v520_v16 = vld [vmem:[%s939_s4] ss:$0 sm:$0xff]  ;;  %p658_p12 = pnand %p657_p11, %p793_p5  ;;  %s724_s22 = smov [#allocation2]  }
  0x17   : > { %s518_s6 = sshll.u32 %s217_s30, 3  ;;  %590 = vmatpush3.bf16.msra.mxu1 %v589_v20  ;;  %s892_s30 = scalar_lea.hbm %s940_s5, %s522_s16 }
  0x18   : > { %s219_s9 = scalar_lea.vmem %s935_s0, %s518_s6  ;;  %591 = vmatprep.subr.bf16.mxu1 %v721_v17  ;;  %s441_s6 = scalar_lea.sflag [#allocation3], %s213_s12 }
  0x19   : > { %v220_v13 = vld [vmem:[%s219_s9] sm:$0xff]  ;;  %p659_p13 = pneg %p658_p12  ;;  %s660_s8 = sshll.u32 %s724_s22, 4  ;;  %s661_s8 = int_to_ptr.vmem [resolvable:$false] %s660_s8 }
  0x1a   : > { %519 = vmatmul.mubr.msk.f32.vlgmr.msra.gmra.mrb[0].mxu0 %vm241_vm0, %v220_v13  ;;  %s662_s9 = scalar_lea.vmem %s661_s8, 256  ;;  %p663_p0 = scmp.lt.s32.totalorder %s894_s23, %s661_s8 }
  0x1b   : > { %593 = vmatpush3.bf16.msra.mxu1 %v592_v23  ;;  %p664_p1 = scmp.lt.s32.totalorder %s662_s9, %s656_s7 }
  0x1c   : > { %594 = vmatprep.subr.bf16.mxu1 %v721_v17 }
  0x1d   : > { %p665_p2 = por %p664_p1, %p663_p0 }
  0x1f   : > { %596 = vmatpush3.bf16.msra.mxu1 %v595_v26  ;;  %p666_p3 = pnand %p665_p2, %p659_p13 }
  0x20   : > { %597 = vmatprep.subr.bf16.mxu1 %v721_v17 }
  0x23   : > { %599 = vmatpush3.bf16.msra.mxu1 %v598_v29 }
  0x24   : > { %600 = vmatprep.subr.bf16.mxu1 %v721_v17 }
  0x27   : > { %602 = vmatpush3.bf16.msra.mxu1 %v601_v32 }
  0x28   : > { %603 = vmatprep.subr.bf16.mxu1 %v721_v17 }
  0x2b   : > { %605 = vmatpush3.bf16.msra.mxu1 %v604_v35 }
  0x2c   : > { %606 = vmatprep.subr.bf16.mxu1 %v721_v17 }
  0x2f   : > { %608 = vmatpush3.bf16.msra.mxu1 %v607_v38 }
  0xed   : > { %v311_v44 = vpop.f32.mrb[0].mxu0 }
  0xee   : > { %v313_v45 = vpop.f32.mrb[1].mxu0  ;;  %v312_v13 = vadd.f32 %v311_v44, %v234_v9 }
  0xef   : > { %v314_v46 = vadd.f32 %v313_v45, %v238_v43 }
  0xf1   : > { %v317_v47 = vmul.f32 0.70710677, %v314_v46  ;;  %v316_v11 = vmul.f32 0.5, %v314_v46 }
  0xf3   : > { %v318_v48 = vand.u32 2147483647, %v317_v47  ;;  %vm340_vm2 = vcmp.lt.f32.partialorder %v317_v47, 0.0 }
  0xf4   : > { %v341_v8 = vsel %vm340_vm2, -1.0, %v723_v7 }
  0xf5   : > { %v319_v49 = vmul.f32 0.3275911, %v318_v48  ;;  %v334_v53 = vmul.f32 %v318_v48, %v318_v48 }
  0xf7   : > { %v320_v50 = vadd.f32 1.0, %v319_v49  ;;  %v335_v56 = vsub.f32 0.0, %v334_v53 }
  0xf9   : > { %652 = vrcp.f32 %v320_v50  ;;  %v336_v59 = vmul.f32 1.442695, %v335_v56 }
  0xfb   : > { %654 = vpow2.f32 %v336_v59 }
 0x103   : > { %v653_v51 = vpop.eup %652 }
 0x104   : > { %v322_v52 = vmul.f32 %v653_v51, %v320_v50 }
 0x105   : > { %v655_v3 = vpop.eup %654 }
 0x106   : > { %v323_v54 = vsub.f32 2.0, %v322_v52 }
 0x108   : > { %v324_v55 = vmul.f32 %v653_v51, %v323_v54 }
 0x10a   : > { %v325_v57 = vmul.f32 1.0614054, %v324_v55 }
 0x10c   : > { %v326_v58 = vadd.f32 -1.4531521, %v325_v57 }
 0x10e   : > { %v327_v60 = vmul.f32 %v326_v58, %v324_v55 }
 0x110   : > { %v328_v61 = vadd.f32 1.4214138, %v327_v60 }
 0x112   : > { %v329_v62 = vmul.f32 %v328_v61, %v324_v55 }
 0x114   : > { %v330_v63 = vadd.f32 -0.28449672, %v329_v62 }
 0x116   : > { %v331_v0 = vmul.f32 %v330_v63, %v324_v55 }
 0x118   : > { %v332_v1 = vadd.f32 0.2548296, %v331_v0 }
 0x11a   : > { %v333_v2 = vmul.f32 %v332_v1, %v324_v55 }
 0x11c   : > { %v338_v5 = vmul.f32 %v655_v3, %v333_v2 }
 0x11e   : > { %v339_v6 = vsub.f32 1.0, %v338_v5 }
 0x120   : > { %v342_v10 = vmul.f32 %v341_v8, %v339_v6 }
 0x122   : > { %v343_v12 = vadd.f32 1.0, %v342_v10 }
 0x124   : > { %v344_v14 = vmul.f32 %v343_v12, %v316_v11 }
 0x126   : > { %v345_v15 = vmul.f32 %v344_v14, %v312_v13 }
 0x128   : > { %575 = vmatmul.mubr.f32.vlgmr.msra.gmra.mrb[0].mxu1 %v345_v15 }
 0x1fb   : > { %v435_v17 = vpop.f32.mrb[0].mxu1 }
 0x1fc   : > { %v436_v18 = vadd.f32 %v520_v16, %v435_v17  ;;  %v576_v19 = vpop.f32.mrb[1].mxu1 }
 0x1fe   : > { %439 = vst.msk [vmem:[%s215_s17] sm:$0xff] %vm241_vm0, %v436_v18 }
 0x1ff   : > { %669 = shalt.err (!%p666_p3)
}
 0x200   : > { %s670_s10 = scalar_lea.hbm %s892_s30, 128  ;;  %s674_s13 = scalar_lea.hbm %s940_s5, 256 }
 0x201   : > { %p671_p4 = scmp.ne.s32.totalorder %s892_s30, %s670_s10  ;;  %p675_p9 = scmp.lt.u32.totalorder %s892_s30, %s940_s5 }
 0x202   : > { %p676_p10 = scmp.lt.u32.totalorder %s674_s13, %s670_s10  ;;  %p678_p12 = scmp.lt.u32.totalorder %s670_s10, %s892_s30 }
 0x203   : > { %p672_p7 = pnand %p671_p4, %p793_p5 }
 0x204   : > { %p677_p11 = por %p676_p10, %p675_p9 }
 0x205   : > { %p673_p8 = pneg %p672_p7 }
 0x206   : > { %p679_p13 = por %p678_p12, %p677_p11 }
 0x208   : > { %p680_p0 = pnand %p679_p13, %p673_p8 }
 0x20a   : > { %683 = shalt.err (!%p680_p0)
}
 0x20b   : > { %609 = dma.vmem_to_hbm [thread:$0]  (%p793_p5), %s894_s23, 128, %s892_s30, %s441_s6  }
 0x20c PF: > { %p615_p1 = scmp.ge.s32.totalorder %s718_s21, 2  ;;  %s466_s16 = sand.u32 1, %s706_s18  }
 0x20d   : > { %s467_s17 = scalar_lea.sflag [#allocation3], %s466_s16 }
 0x20e   : > { %p612_p2 = pnand %p615_p1, %p797_p6 }
 0x210   : > { %701 = dma.done.wait (!%p612_p2), %s467_s17, 128  }
 0x211   : > { %703 = vsyncadd (!%p612_p2), %s467_s17, 4294967168  ;;  %p15_p3 = scmp.ge.s32.totalorder %s780_s24, 4   ;;  %s943_s18 = smov %s710_s19 }
 0x212   : > { %s944_s19 = smov %s714_s20  ;;  %s945_s20 = smov %s791_s27 }
 0x213   : > { %s946_s21 = smov %s780_s24  ;;  %17 = sbr.rel (!%p15_p3) target bundleno = 3 (0x3), region = 75 }
 0x21a   :  { %472 = vsyncpa [#allocation3], 1 }
 0x21b   :  { %474 = vsyncpa [#allocation3 + $0x1], 1 }

</bundles_post_ra>
